<compile_context>
chip_gen: v7x
topology: tpu7x:2x2x1
jax: 0.10.0
libtpu: 0.0.40
codegen_flags: <defaults>
</compile_context>

<pallas_src>
import functools

import jax
import jax.numpy as jnp
from jax.experimental import pallas as pl
from jax.experimental.pallas import tpu as pltpu


def _jointnet_kernel(x_ref, z_ref, w1x_ref, w1z_ref, b1_ref,
                     w2_ref, b2_ref, w3_ref, b3_ref, o_ref):
    # Cast inputs to bf16 in-kernel (cheap VPU cast; avoids a separate HBM pass).
    x = x_ref[...].astype(jnp.bfloat16)
    z = z_ref[...].astype(jnp.bfloat16)

    # Layer 1: split-K matmul replaces concat([x, z], -1) @ W1 (f32 accumulate).
    h1 = jnp.dot(x, w1x_ref[...], preferred_element_type=jnp.float32)
    h1 = h1 + jnp.dot(z, w1z_ref[...], preferred_element_type=jnp.float32)
    # bf16 epilogue: bias + ReLU in bf16, feeds the layer-2 MXU directly.
    h1 = jnp.maximum(h1.astype(jnp.bfloat16) + b1_ref[...], 0)      # (tb, H1) bf16

    # Layer 2 (bf16 MXU, f32 accumulate, f32 epilogue).
    h2 = jnp.dot(h1, w2_ref[...], preferred_element_type=jnp.float32)
    h2 = jnp.maximum(h2 + b2_ref[...], 0.0)                         # (tb, H2) f32

    # Layer 3 (out_features=1): VPU multiply + XLU lane reduce instead of an
    # almost-empty (N=1) MXU matmul.
    out = jnp.sum(h2 * w3_ref[...], axis=-1, keepdims=True)         # (tb, 1) f32
    o_ref[...] = (out + b3_ref[0]).astype(o_ref.dtype)


def _round_up(n, m):
    return ((n + m - 1) // m) * m


@functools.partial(jax.jit, static_argnames=("tile_b",))
def jointnet_forward(x, z, prepared_params, tile_b=4096):
    """x: (B, x_dim) f32, z: (B, z_dim) f32. Returns (B, 1) float32."""
    w1x, w1z, b1, w2, b2, w3_row, b3 = prepared_params
    B, x_dim = x.shape
    z_dim = z.shape[1]
    H1 = w1x.shape[1]
    H2 = w2.shape[1]

    # Batch tile: large (amortizes the ~0.35 us/step grid overhead), but capped
    # at ceil(B/2) rounded to 8 so the "parallel" batch axis has >=2 grid steps
    # whenever B allows it (v7x has 2 TensorCores).
    tb = min(int(tile_b), _round_up(pl.cdiv(B, 2), 8))
    tb = _round_up(max(tb, 8), 8)
    grid = (pl.cdiv(B, tb),)

    batch_spec = lambda d: pl.BlockSpec((tb, d), lambda i: (i, 0))
    const_spec = lambda s: pl.BlockSpec(s, lambda i: (0, 0))

    return pl.pallas_call(
        _jointnet_kernel,
        out_shape=jax.ShapeDtypeStruct((B, 1), jnp.float32),
        grid=grid,
        in_specs=[
            batch_spec(x_dim),                                   # x  (tiled, f32)
            batch_spec(z_dim),                                   # z  (tiled, f32)
            const_spec((x_dim, H1)),                             # W1[:x_dim] bf16
            const_spec((z_dim, H1)),                             # W1[x_dim:] bf16
            const_spec((1, H1)),                                 # b1 bf16
            const_spec((H1, H2)),                                # W2 bf16
            const_spec((1, H2)),                                 # b2 f32
            const_spec((1, H2)),                                 # W3 as a row, f32
            pl.BlockSpec(memory_space=pltpu.MemorySpace.SMEM),   # b3 scalar
        ],
        out_specs=pl.BlockSpec((tb, 1), lambda i: (i, 0)),
        compiler_params=pltpu.CompilerParams(
            dimension_semantics=("parallel",),
            vmem_limit_bytes=32 * 1024 * 1024),
    )(x, z, w1x, w1z, b1, w2, b2, w3_row, b3)


def prepare_jointnet_params(params, x_dim):
    """One-time prep: split W1 along the concat axis (kernel never materializes
    the concat), cast MXU weights + b1 to bf16, reshape W3/b3 for the VPU path."""
    w1, b1, w2, b2, w3, b3 = params
    return (
        w1[:x_dim].astype(jnp.bfloat16),            # (x_dim, H1)
        w1[x_dim:].astype(jnp.bfloat16),            # (z_dim, H1)
        b1.reshape(1, -1).astype(jnp.bfloat16),     # (1, H1)  bf16 epilogue
        w2.astype(jnp.bfloat16),                    # (H1, H2)
        b2.reshape(1, -1).astype(jnp.float32),      # (1, H2)
        w3.reshape(1, -1).astype(jnp.float32),      # (1, H2)
        b3.reshape(-1).astype(jnp.float32),         # (1,)
    )


def init_jointnet_params(key, x_dim, z_dim, hidden_dims=(128, 64)):
    """Deterministic init mimicking torch.nn.Linear default (U[-1/sqrt(fan_in), +])."""
    dims = [x_dim + z_dim] + list(hidden_dims) + [1]
    params = []
    for i in range(len(dims) - 1):
        fan_in, fan_out = dims[i], dims[i + 1]
        key, kw, kb = jax.random.split(key, 3)
        bound = 1.0 / jnp.sqrt(jnp.float32(fan_in))
        w = jax.random.uniform(kw, (fan_in, fan_out), jnp.float32,
                               minval=-bound, maxval=bound)
        b = jax.random.uniform(kb, (1, fan_out), jnp.float32,
                               minval=-bound, maxval=bound)
        params.extend([w, b])
    return tuple(params)


def jointnet_reference(x, z, params):
    """Pure-JAX reference mirroring the kernel's bf16 quantization contract
    (bf16 x/z/W1/W2/b1/h1, f32 accumulation, f32 layer-2/3 epilogue)."""
    w1, b1, w2, b2, w3, b3 = params
    bf, f32 = jnp.bfloat16, jnp.float32
    q = lambda a: a.astype(bf).astype(f32)
    c = jnp.concatenate([q(x), q(z)], axis=1)
    h1 = c @ q(w1)
    h1 = jnp.maximum(h1.astype(bf) + b1.astype(bf), 0).astype(f32)
    h2 = jnp.maximum(h1 @ q(w2) + b2, 0.0)
    return h2 @ w3 + b3


if __name__ == "__main__":
    key = jax.random.PRNGKey(0)
    kx, kz, kp, kx2, kz2 = jax.random.split(key, 5)

    x_dim, z_dim = 16, 16
    params = init_jointnet_params(kp, x_dim, z_dim, hidden_dims=(128, 64))
    prepared = prepare_jointnet_params(params, x_dim)

    # Small batch: single grid step.
    B = 8
    x = jax.random.normal(kx, (B, x_dim), jnp.float32)
    z = jax.random.normal(kz, (B, z_dim), jnp.float32)
    out = jax.block_until_ready(jointnet_forward(x, z, prepared))
    ref = jointnet_reference(x, z, params)
    assert out.shape == (B, 1), out.shape
    assert jnp.allclose(out, ref, atol=5e-3, rtol=5e-3), (
        f"max abs err {float(jnp.max(jnp.abs(out - ref)))}")

    # Larger batch, default tile: tile cap guarantees >=2 grid steps.
    B2 = 300
    x2 = jax.random.normal(kx2, (B2, x_dim), jnp.float32)
    z2 = jax.random.normal(kz2, (B2, z_dim), jnp.float32)
    out2 = jax.block_until_ready(jointnet_forward(x2, z2, prepared))
    ref2 = jointnet_reference(x2, z2, params)
    assert out2.shape == (B2, 1), out2.shape
    assert jnp.allclose(out2, ref2, atol=5e-3, rtol=5e-3), (
        f"max abs err {float(jnp.max(jnp.abs(out2 - ref2)))}")

    # Explicit small tile: multi-step grid with a partial last tile (masked writes).
    out3 = jax.block_until_ready(jointnet_forward(x2, z2, prepared, tile_b=128))
    assert jnp.allclose(out3, ref2, atol=5e-3, rtol=5e-3), (
        f"max abs err {float(jnp.max(jnp.abs(out3 - ref2)))}")

    print("KERNEL_OK")
</pallas_src>

<mosaic_0001>
module attributes {stable_mosaic.version = 11 : i64} {
  func.func @_jointnet_kernel(%arg0: i32, %arg1: memref<8x16xf32, #tpu.memory_space<vmem>>, %arg2: memref<8x16xf32, #tpu.memory_space<vmem>>, %arg3: memref<16x128xbf16, #tpu.memory_space<vmem>>, %arg4: memref<16x128xbf16, #tpu.memory_space<vmem>>, %arg5: memref<1x128xbf16, #tpu.memory_space<vmem>>, %arg6: memref<128x64xbf16, #tpu.memory_space<vmem>>, %arg7: memref<1x64xf32, #tpu.memory_space<vmem>>, %arg8: memref<1x64xf32, #tpu.memory_space<vmem>>, %arg9: memref<1xf32, #tpu.memory_space<smem>>, %arg10: memref<8x1xf32, #tpu.memory_space<vmem>>) attributes {dimension_semantics = [#tpu.dimension_semantics<parallel>], iteration_bounds = array<i64: 1>, scalar_prefetch = 0 : i64, scratch_operands = 0 : i64, tpu.core_type = #tpu.core_type<tc>, window_params = [{transform_indices = @transform_0, window_bounds = array<i64: 8, 16>}, {transform_indices = @transform_1, window_bounds = array<i64: 8, 16>}, {pipeline_mode = #tpu.pipeline_mode<synchronous>, transform_indices = @transform_2, window_bounds = array<i64: 16, 128>}, {pipeline_mode = #tpu.pipeline_mode<synchronous>, transform_indices = @transform_3, window_bounds = array<i64: 16, 128>}, {pipeline_mode = #tpu.pipeline_mode<synchronous>, transform_indices = @transform_4, window_bounds = array<i64: 1, 128>}, {pipeline_mode = #tpu.pipeline_mode<synchronous>, transform_indices = @transform_5, window_bounds = array<i64: 128, 64>}, {pipeline_mode = #tpu.pipeline_mode<synchronous>, transform_indices = @transform_6, window_bounds = array<i64: 1, 64>}, {pipeline_mode = #tpu.pipeline_mode<synchronous>, transform_indices = @transform_7, window_bounds = array<i64: 1, 64>}, {transform_indices = @transform_8, window_bounds = array<i64: 1>}, {transform_indices = @transform_9, window_bounds = array<i64: 8, 1>}]} {
    %c0 = arith.constant 0 : index
    %c0_0 = arith.constant 0 : index
    %0 = vector.load %arg1[%c0, %c0_0] : memref<8x16xf32, #tpu.memory_space<vmem>>, vector<8x16xf32>
    %1 = arith.truncf %0 : vector<8x16xf32> to vector<8x16xbf16>
    %c0_1 = arith.constant 0 : index
    %c0_2 = arith.constant 0 : index
    %2 = vector.load %arg2[%c0_1, %c0_2] : memref<8x16xf32, #tpu.memory_space<vmem>>, vector<8x16xf32>
    %3 = arith.truncf %2 : vector<8x16xf32> to vector<8x16xbf16>
    %c0_3 = arith.constant 0 : index
    %c0_4 = arith.constant 0 : index
    %4 = vector.load %arg3[%c0_3, %c0_4] : memref<16x128xbf16, #tpu.memory_space<vmem>>, vector<16x128xbf16>
    %cst = arith.constant dense<0.000000e+00> : vector<8x128xf32>
    %5 = tpu.matmul %1, %4, %cst {dimension_numbers = #tpu.dot_dimension_numbers<[1], [0], [0], [1], [0, 0, 1, 1], [], []>} : vector<8x16xbf16>, vector<16x128xbf16>, vector<8x128xf32> -> vector<8x128xf32>
    %c0_5 = arith.constant 0 : index
    %c0_6 = arith.constant 0 : index
    %6 = vector.load %arg4[%c0_5, %c0_6] : memref<16x128xbf16, #tpu.memory_space<vmem>>, vector<16x128xbf16>
    %cst_7 = arith.constant dense<0.000000e+00> : vector<8x128xf32>
    %7 = tpu.matmul %3, %6, %cst_7 {dimension_numbers = #tpu.dot_dimension_numbers<[1], [0], [0], [1], [0, 0, 1, 1], [], []>} : vector<8x16xbf16>, vector<16x128xbf16>, vector<8x128xf32> -> vector<8x128xf32>
    %8 = arith.addf %5, %7 : vector<8x128xf32>
    %9 = arith.truncf %8 : vector<8x128xf32> to vector<8x128xbf16>
    %c0_8 = arith.constant 0 : index
    %c0_9 = arith.constant 0 : index
    %10 = vector.load %arg5[%c0_8, %c0_9] : memref<1x128xbf16, #tpu.memory_space<vmem>>, vector<1x128xbf16>
    %11 = vector.broadcast %10 : vector<1x128xbf16> to vector<8x128xbf16>
    %12 = arith.addf %9, %11 : vector<8x128xbf16>
    %cst_10 = arith.constant 0.000000e+00 : bf16
    %13 = vector.broadcast %cst_10 : bf16 to vector<8x128xbf16>
    %14 = arith.maximumf %12, %13 : vector<8x128xbf16>
    %c0_11 = arith.constant 0 : index
    %c0_12 = arith.constant 0 : index
    %15 = vector.load %arg6[%c0_11, %c0_12] : memref<128x64xbf16, #tpu.memory_space<vmem>>, vector<128x64xbf16>
    %cst_13 = arith.constant dense<0.000000e+00> : vector<8x64xf32>
    %16 = tpu.matmul %14, %15, %cst_13 {dimension_numbers = #tpu.dot_dimension_numbers<[1], [0], [0], [1], [0, 0, 1, 1], [], []>} : vector<8x128xbf16>, vector<128x64xbf16>, vector<8x64xf32> -> vector<8x64xf32>
    %c0_14 = arith.constant 0 : index
    %c0_15 = arith.constant 0 : index
    %17 = vector.load %arg7[%c0_14, %c0_15] : memref<1x64xf32, #tpu.memory_space<vmem>>, vector<1x64xf32>
    %18 = vector.broadcast %17 : vector<1x64xf32> to vector<8x64xf32>
    %19 = arith.addf %16, %18 : vector<8x64xf32>
    %cst_16 = arith.constant 0.000000e+00 : f32
    %20 = vector.broadcast %cst_16 : f32 to vector<8x64xf32>
    %21 = arith.maximumf %19, %20 : vector<8x64xf32>
    %c0_17 = arith.constant 0 : index
    %c0_18 = arith.constant 0 : index
    %22 = vector.load %arg8[%c0_17, %c0_18] : memref<1x64xf32, #tpu.memory_space<vmem>>, vector<1x64xf32>
    %23 = vector.broadcast %22 : vector<1x64xf32> to vector<8x64xf32>
    %24 = arith.mulf %21, %23 : vector<8x64xf32>
    %cst_19 = arith.constant dense<0.000000e+00> : vector<8xf32>
    %25 = vector.multi_reduction <add>, %24, %cst_19 [1] : vector<8x64xf32> to vector<8xf32>
    %26 = vector.shape_cast %25 : vector<8xf32> to vector<8x1xf32>
    %c0_20 = arith.constant 0 : index
    %27 = memref.load %arg9[%c0_20] : memref<1xf32, #tpu.memory_space<smem>>
    %28 = vector.broadcast %27 : f32 to vector<8x1xf32>
    %29 = arith.addf %26, %28 : vector<8x1xf32>
    %c0_21 = arith.constant 0 : index
    %c0_22 = arith.constant 0 : index
    %30 = vector.load %arg10[%c0_21, %c0_22] : memref<8x1xf32, #tpu.memory_space<vmem>>, vector<8x1xf32>
    tpu.vector_store %arg10[%c0_21, %c0_22], %29 {strides = array<i32>} : memref<8x1xf32, #tpu.memory_space<vmem>>, vector<8x1xf32>,
    return
  }
  func.func @transform_0(%arg0: i32) -> (i32, i32) {
    %c0_i32 = arith.constant 0 : i32
    %c0_i32_0 = arith.constant 0 : i32
    return %arg0, %c0_i32 : i32, i32
  }
  func.func @transform_1(%arg0: i32) -> (i32, i32) {
    %c0_i32 = arith.constant 0 : i32
    %c0_i32_0 = arith.constant 0 : i32
    return %arg0, %c0_i32 : i32, i32
  }
  func.func @transform_2(%arg0: i32) -> (i32, i32) {
    %c0_i32 = arith.constant 0 : i32
    %c0_i32_0 = arith.constant 0 : i32
    %c0_i32_1 = arith.constant 0 : i32
    return %c0_i32, %c0_i32_0 : i32, i32
  }
  func.func @transform_3(%arg0: i32) -> (i32, i32) {
    %c0_i32 = arith.constant 0 : i32
    %c0_i32_0 = arith.constant 0 : i32
    %c0_i32_1 = arith.constant 0 : i32
    return %c0_i32, %c0_i32_0 : i32, i32
  }
  func.func @transform_4(%arg0: i32) -> (i32, i32) {
    %c0_i32 = arith.constant 0 : i32
    %c0_i32_0 = arith.constant 0 : i32
    %c0_i32_1 = arith.constant 0 : i32
    return %c0_i32, %c0_i32_0 : i32, i32
  }
  func.func @transform_5(%arg0: i32) -> (i32, i32) {
    %c0_i32 = arith.constant 0 : i32
    %c0_i32_0 = arith.constant 0 : i32
    %c0_i32_1 = arith.constant 0 : i32
    return %c0_i32, %c0_i32_0 : i32, i32
  }
  func.func @transform_6(%arg0: i32) -> (i32, i32) {
    %c0_i32 = arith.constant 0 : i32
    %c0_i32_0 = arith.constant 0 : i32
    %c0_i32_1 = arith.constant 0 : i32
    return %c0_i32, %c0_i32_0 : i32, i32
  }
  func.func @transform_7(%arg0: i32) -> (i32, i32) {
    %c0_i32 = arith.constant 0 : i32
    %c0_i32_0 = arith.constant 0 : i32
    %c0_i32_1 = arith.constant 0 : i32
    return %c0_i32, %c0_i32_0 : i32, i32
  }
  func.func @transform_8(%arg0: i32) -> i32 {
    %c0_i32 = arith.constant 0 : i32
    %c0_i32_0 = arith.constant 0 : i32
    return %c0_i32 : i32
  }
  func.func @transform_9(%arg0: i32) -> (i32, i32) {
    %c0_i32 = arith.constant 0 : i32
    %c0_i32_0 = arith.constant 0 : i32
    return %arg0, %c0_i32 : i32, i32
  }
}

</mosaic_0001>

<bundles_post_ra>
// kernel: jointnet_forward.1
= control target key start
LH: loop header
LB: loop body
LE: loop exit
PB: predicated region body
PF: predicated region fallthrough
CT: control target
= control target key end

     0   :  { %v361_v0 = vmov 0.0   ;;  %vm362_vm0 = vmmov 0   ;;  %vm48_vm1 = vcmask 130048   ;;  %v146_v15 = vlaneseq  ;;  %s470_s3 = inlined_call_operand.vmem [shape: bf16[16,128], index: 3, kind: input, shape index: {}]   ;;  %s471_s1 = inlined_call_operand.vmem [shape: f32[8,16], index: 1, kind: input, shape index: {}]   ;;  %s472_s2 = inlined_call_operand.vmem [shape: bf16[16,128], index: 2, kind: input, shape index: {}]   ;;  %s473_s5 = inlined_call_operand.vmem [shape: bf16[128,64], index: 5, kind: input, shape index: {}]   ;;  %s474_s0 = inlined_call_operand.vmem [shape: f32[8,16], index: 0, kind: input, shape index: {}]   ;;  %s475_s4 = inlined_call_operand.vmem [shape: bf16[1,128], index: 4, kind: input, shape index: {}]   ;;  %s476_s6 = inlined_call_operand.vmem [shape: f32[1,64], index: 6, kind: input, shape index: {}]   ;;  %s477_s7 = inlined_call_operand.vmem [shape: f32[1,64], index: 7, kind: input, shape index: {}]   ;;  %s478_s8 = inlined_call_operand.<no memory space> [shape: f32[1], index: 8, kind: input, shape index: {}]   ;;  %s479_s9 = inlined_call_operand.vmem [shape: f32[8,1], index: 9, kind: output, shape index: {}]  }
   0x1   :  { %312 = vmatprep.subr.bf16.mxu0 %v361_v0  ;;  %v351_v1 = vld [vmem:[%s470_s3] sm:$0xff]   ;;  %314 = vmatprep.mubr.msk.bf16.mxu0 %vm362_vm0, %v361_v0  ;;  %v354_v6 = vld [vmem:[%s473_s5 + $0x8] sm:$0xff]   ;;  %v355_v7 = vld [vmem:[%s473_s5 + $0x10] sm:$0xff]   ;;  %v363_v27 = vmov 0   ;;  %vm272_vm2 = vcmask 523264   ;;  %v277_v39 = vstv %s478_s8  ;;  %vm279_vm3 = vcmask 7168  }
   0x2   :  { %v36_v2 = vld [vmem:[%s471_s1] sm:$0xff]  ;;  %324 = vmatprep.subr.bf16.mxu1 %v361_v0  ;;  %340 = vmatprep.mubr.msk.bf16.mxu1 %vm362_vm0, %v361_v0  ;;  %v356_v10 = vld [vmem:[%s473_s5 + $0x18] sm:$0xff]   ;;  %v358_v12 = vld [vmem:[%s473_s5 + $0x28] sm:$0xff]   ;;  %v147_v16 = vshrl.u32 %v146_v15, 7 }
   0x3   :  { %313 = vmatpush3.bf16.msra.mxu0 %v351_v1  ;;  %v37_v3 = vpack.c.bf16 %v36_v2, %v36_v2  ;;  %v352_v4 = vld [vmem:[%s472_s2] sm:$0xff]   ;;  %v359_v13 = vld [vmem:[%s473_s5 + $0x30] sm:$0xff]   ;;  %v360_v14 = vld [vmem:[%s473_s5 + $0x38] sm:$0xff]  }
   0x4   :  { %318 = vmatprep.subr.bf16.mxu0 %v361_v0  ;;  %v353_v5 = vld [vmem:[%s473_s5] sm:$0xff]   ;;  %v148_v19 = vsub.s32 0, %v147_v16 }
   0x5   :  { %325 = vmatpush3.bf16.msra.mxu1 %v353_v5  ;;  %v34_v8 = vld [vmem:[%s474_s0] sm:$0xff] }
   0x6   :  { %315 = vmatmul.mubr.msk.bf16.vlgmr.msra.gmra.mrb[0].mxu0 %vm48_vm1, %v37_v3  ;;  %326 = vmatprep.subr.bf16.mxu1 %v361_v0  ;;  %v35_v9 = vpack.c.bf16 %v34_v8, %v34_v8  ;;  %v357_v11 = vld [vmem:[%s473_s5 + $0x20] sm:$0xff]  }
   0x7   :  { %319 = vmatpush3.bf16.msra.mxu0 %v352_v4  ;;  %320 = vmatprep.mubr.msk.bf16.mxu0 %vm362_vm0, %v361_v0  ;;  %v142_v17 = vld [vmem:[%s475_s4] sm:$0x1] }
   0x8   :  { %v144_v18 = vpack.i.b16 %v142_v17, %v142_v17  ;;  %v289_v29 = vld [vmem:[%s476_s6] ss:$0 sm:$0xff] }
   0x9   :  { %327 = vmatpush3.bf16.msra.mxu1 %v354_v6  ;;  %v298_v34 = vld [vmem:[%s477_s7] ss:$0 sm:$0xff] }
   0xa   :  { %328 = vmatprep.subr.bf16.mxu1 %v361_v0  ;;  %v149_v20 = vrot.slane %v144_v18, %v148_v19 }
   0xd   :  { %329 = vmatpush3.bf16.msra.mxu1 %v355_v7 }
   0xe   :  { %330 = vmatprep.subr.bf16.mxu1 %v361_v0 }
  0x11   :  { %331 = vmatpush3.bf16.msra.mxu1 %v356_v10 }
  0x12   :  { %321 = vmatmul.mubr.msk.bf16.vlgmr.msra.gmra.mrb[0].mxu0 %vm48_vm1, %v35_v9  ;;  %332 = vmatprep.subr.bf16.mxu1 %v361_v0 }
  0x15   :  { %333 = vmatpush3.bf16.msra.mxu1 %v357_v11 }
  0x16   :  { %334 = vmatprep.subr.bf16.mxu1 %v361_v0 }
  0x19   :  { %335 = vmatpush3.bf16.msra.mxu1 %v358_v12 }
  0x1a   :  { %336 = vmatprep.subr.bf16.mxu1 %v361_v0 }
  0x1d   :  { %337 = vmatpush3.bf16.msra.mxu1 %v359_v13 }
  0x1e   :  { %338 = vmatprep.subr.bf16.mxu1 %v361_v0 }
  0x21   :  { %339 = vmatpush3.bf16.msra.mxu1 %v360_v14 }
  0xe5   :  { %v135_v21 = vpop.f32.mrb[0].mxu0 }
  0xe6   :  { %v141_v22 = vpack.c.bf16 %v135_v21, %v135_v21  ;;  %v322_v23 = vpop.f32.mrb[1].mxu0 }
  0xe7   :  { %v138_v24 = vpop.f32.mrb[2].mxu0 }
  0xe8   :  { %v150_v25 = vadd.bf16 %v149_v20, %v141_v22  ;;  %v323_v26 = vpop.f32.mrb[3].mxu0 }
  0xea   :  { %v151_v28 = vmax.bf16 %v363_v27, %v150_v25 }
  0xec   :  { %341 = vmatmul.mubr.bf16.vlgmr.msra.gmra.mrb[0].mxu1 %v151_v28 }
 0x1bf   :  { %v257_v30 = vpop.f32.mrb[0].mxu1 }
 0x1c0   :  { %v258_v31 = vadd.f32 %v289_v29, %v257_v30  ;;  %v342_v32 = vpop.f32.mrb[1].mxu1 }
 0x1c1   :  { %v260_v33 = vpop.f32.mrb[2].mxu1 }
 0x1c2   :  { %v263_v35 = vmax.f32 %v258_v31, 0.0  ;;  %v343_v36 = vpop.f32.mrb[3].mxu1 }
 0x1c4   :  { %v271_v37 = vmul.f32 %v298_v34, %v263_v35 }
 0x1c6   :  { %v273_v38 = vsel %vm272_vm2, %v271_v37, 0.0 }
 0x1c7   :  { %274 = vadd.xlane.f32.xlu0 %v273_v38 }
 0x254   :  { %v275_v40 = vpop.xlane.xlu0 %274 }
 0x255   :  { %v278_v41 = vadd.f32 %v277_v39, %v275_v40 }
 0x257   :  { %280 = vst.msk [vmem:[%s479_s9] sm:$0xff] %vm279_vm3, %v278_v41 }

</bundles_post_ra>
